<compile_context>
chip_gen: v6e
topology: v6e:2x2x1
jax: 0.10.0
libtpu: 0.0.40
codegen_flags: <defaults>
</compile_context>

<pallas_src>
import jax
import jax.numpy as jnp
from jax import lax
from jax.experimental import pallas as pl
from jax.experimental.pallas import tpu as pltpu


def _pick_batch_tile(B, L, C_in, C_out, ks_list, itemsize, budget_bytes=10 << 20):
    """Largest power-of-two batch tile (capped at min(B, 16)) whose
    double-buffered working set fits comfortably under the smallest default
    scoped-VMEM budget (16 MiB on v5e, 32 MiB on v6e/v7x)."""

    def working_set(tb):
        x_b = tb * L * C_in * itemsize                                         # x block
        o_b = sum(tb * C_out * (L - ks + 1) * itemsize for ks in ks_list)      # out blocks
        w_b = sum(C_out * ks * C_in * itemsize + 4 * C_out for ks in ks_list)  # weights+bias
        tmp = max((L - ks + 1) * (ks * C_in * itemsize + 4 * C_out)            # lhs + f32 acc
                  for ks in ks_list)
        return 2 * (x_b + o_b) + w_b + tmp          # x2: double buffering of I/O blocks

    cap = max(1, min(B, 16))
    tb = 1
    while tb * 2 <= cap and working_set(tb * 2) <= budget_bytes:
        tb *= 2
    return tb


def fused_conv1d_relu(x, packed):
    """Fused multi-kernel-size 1-D conv + ReLU.

    x      : (B, L, C_in)   channels-last activations (the module's `feature`)
    packed : list of (w2, bias, ks) with
               w2   : (C_out, ks*C_in)  -- columns ordered [tap k, channel c]
               bias : (C_out, 1) float32
    returns: list of (B, C_out, L - ks + 1)  (PyTorch NCL layout, ReLU applied)
    """
    B, L, C_in = x.shape
    n = len(packed)
    ks_list = tuple(int(ks) for (_, _, ks) in packed)
    C_out = int(packed[0][0].shape[0])
    l_outs = tuple(L - ks + 1 for ks in ks_list)
    if min(l_outs) <= 0:
        raise ValueError("sequence length must be >= the largest kernel size")

    TB = _pick_batch_tile(B, L, C_in, C_out, ks_list, x.dtype.itemsize)
    grid = (pl.cdiv(B, TB),)
    # NOTE: L is kept fully resident per batch row (typical text-CNN seq lens);
    # for very long sequences an additional halo'd L_out tiling would be added.

    def kernel(*refs):
        x_ref = refs[0]
        w_refs = refs[1:1 + n]
        b_refs = refs[1 + n:1 + 2 * n]
        o_refs = refs[1 + 2 * n:1 + 3 * n]
        for w_ref, b_ref, o_ref, ks, lo in zip(w_refs, b_refs, o_refs,
                                               ks_list, l_outs):
            w2 = w_ref[...]                          # (C_out, ks*C_in), x dtype
            bias = b_ref[...].astype(jnp.float32)    # (C_out, 1)
            for bi in range(TB):                     # TB is small & static
                # LHS (lo, ks*C_in): ks shifted Ref slices concatenated along
                # the lane axis (no materialized shifted copies of full x).
                taps = [x_ref[bi, k:k + lo, :] for k in range(ks)]
                lhs = taps[0] if ks == 1 else jnp.concatenate(taps, axis=-1)
                # One MXU matmul per (row, conv): (C_out,K) x (lo,K)^T, f32 acc.
                # "NT" dot_general form -> result is already channels-first.
                y = lax.dot_general(w2, lhs, (((1,), (1,)), ((), ())),
                                    preferred_element_type=jnp.float32)
                y = jnp.maximum(y + bias, 0.0)       # bias + ReLU in f32
                o_ref[bi] = y.astype(o_ref.dtype)    # (C_out, lo) lane-dense store

    in_specs = [pl.BlockSpec((TB, L, C_in), lambda i: (i, 0, 0))]
    in_specs += [pl.BlockSpec(w.shape, lambda i: (0, 0)) for (w, _, _) in packed]
    in_specs += [pl.BlockSpec(bb.shape, lambda i: (0, 0)) for (_, bb, _) in packed]
    out_specs = [pl.BlockSpec((TB, C_out, lo), lambda i: (i, 0, 0))
                 for lo in l_outs]
    out_shape = tuple(jax.ShapeDtypeStruct((B, C_out, lo), x.dtype)
                      for lo in l_outs)

    outs = pl.pallas_call(
        kernel,
        grid=grid,
        in_specs=in_specs,
        out_specs=out_specs,
        out_shape=out_shape,
        compiler_params=pltpu.CompilerParams(
            dimension_semantics=("parallel",)),
    )(x, *(w for (w, _, _) in packed), *(bb for (_, bb, _) in packed))
    return list(outs)


class Conv1dPallas:
    """Mirror of the PyTorch `Conv1d` module: one Conv1d (+ReLU) per kernel
    size, all fused into a single Pallas kernel per forward call."""

    def __init__(self, in_channels, out_channels, kernel_size, key,
                 dtype=jnp.float32):
        self.in_channels = in_channels
        self.out_channels = out_channels
        self.kernel_sizes = tuple(int(ks) for ks in kernel_size)
        self.params = []   # PyTorch layout (C_out, C_in, ks), (C_out,) -- for reference checks
        self.packed = []   # kernel-ready  (C_out, ks*C_in), (C_out, 1), ks
        for i, ks in enumerate(self.kernel_sizes):
            kw, kb = jax.random.split(jax.random.fold_in(key, i))
            # PyTorch default init: U(-sqrt(k), sqrt(k)) with k = 1/(C_in*ks)
            bound = 1.0 / float(in_channels * ks) ** 0.5
            w = jax.random.uniform(kw, (out_channels, in_channels, ks),
                                   jnp.float32, -bound, bound)
            b = jax.random.uniform(kb, (out_channels,), jnp.float32,
                                   -bound, bound)
            self.params.append((w, b))
            # Pre-pack ONCE (hoisted out of the forward pass): fold the taps
            # into the contraction dim; column index = k*C_in + c.
            w2 = jnp.transpose(w, (0, 2, 1)).reshape(out_channels,
                                                     ks * in_channels)
            self.packed.append((w2.astype(dtype),
                                b.reshape(out_channels, 1).astype(jnp.float32),
                                ks))

    def __call__(self, feature):
        # feature: (B, L, C_in).  (The PyTorch forward permutes to NCL
        # internally; the channels-last kernel consumes it directly.)
        packed = self.packed
        if packed and packed[0][0].dtype != feature.dtype:
            packed = [(w.astype(feature.dtype), bb, ks)
                      for (w, bb, ks) in packed]
        return fused_conv1d_relu(feature, packed)


def _ref_conv1d_relu(x, w, b):
    """Pure-JAX reference of F.relu(nn.Conv1d(...)(x.permute(0,2,1)))."""
    B, L, C_in = x.shape
    C_out, _, ks = w.shape
    L_out = L - ks + 1
    acc = jnp.zeros((B, L_out, C_out), jnp.float32)
    for k in range(ks):
        acc = acc + jnp.einsum('blc,oc->blo', x[:, k:k + L_out, :], w[:, :, k])
    acc = acc + b[None, None, :]
    return jnp.maximum(acc, 0.0).transpose(0, 2, 1)


if __name__ == "__main__":
    key = jax.random.PRNGKey(0)
    k_x, k_p = jax.random.split(key)

    B, L, C_in, C_out = 2, 16, 8, 16
    kernel_sizes = (2, 3, 4)

    feature = jax.random.normal(k_x, (B, L, C_in), jnp.float32)

    model = Conv1dPallas(C_in, C_out, kernel_sizes, k_p)
    outs = model(feature)
    outs = [jax.block_until_ready(o) for o in outs]

    # sanity check against a pure-JAX reference
    for (w, b), o, ks in zip(model.params, outs, kernel_sizes):
        ref = _ref_conv1d_relu(feature, w, b)
        assert o.shape == (B, C_out, L - ks + 1), o.shape
        assert jnp.allclose(o, ref, atol=1e-5, rtol=1e-5), "mismatch vs reference"

    print("KERNEL_OK")
</pallas_src>

<mosaic_0001>
module attributes {stable_mosaic.version = 11 : i64} {
  func.func @kernel(%arg0: i32, %arg1: memref<2x16x8xf32, #tpu.memory_space<vmem>>, %arg2: memref<16x16xf32, #tpu.memory_space<vmem>>, %arg3: memref<16x24xf32, #tpu.memory_space<vmem>>, %arg4: memref<16x32xf32, #tpu.memory_space<vmem>>, %arg5: memref<16x1xf32, #tpu.memory_space<vmem>>, %arg6: memref<16x1xf32, #tpu.memory_space<vmem>>, %arg7: memref<16x1xf32, #tpu.memory_space<vmem>>, %arg8: memref<2x16x15xf32, #tpu.memory_space<vmem>>, %arg9: memref<2x16x14xf32, #tpu.memory_space<vmem>>, %arg10: memref<2x16x13xf32, #tpu.memory_space<vmem>>) attributes {dimension_semantics = [#tpu.dimension_semantics<parallel>], iteration_bounds = array<i64: 1>, scalar_prefetch = 0 : i64, scratch_operands = 0 : i64, tpu.core_type = #tpu.core_type<tc>, window_params = [{transform_indices = @transform_0, window_bounds = array<i64: 2, 16, 8>}, {pipeline_mode = #tpu.pipeline_mode<synchronous>, transform_indices = @transform_1, window_bounds = array<i64: 16, 16>}, {pipeline_mode = #tpu.pipeline_mode<synchronous>, transform_indices = @transform_2, window_bounds = array<i64: 16, 24>}, {pipeline_mode = #tpu.pipeline_mode<synchronous>, transform_indices = @transform_3, window_bounds = array<i64: 16, 32>}, {pipeline_mode = #tpu.pipeline_mode<synchronous>, transform_indices = @transform_4, window_bounds = array<i64: 16, 1>}, {pipeline_mode = #tpu.pipeline_mode<synchronous>, transform_indices = @transform_5, window_bounds = array<i64: 16, 1>}, {pipeline_mode = #tpu.pipeline_mode<synchronous>, transform_indices = @transform_6, window_bounds = array<i64: 16, 1>}, {transform_indices = @transform_7, window_bounds = array<i64: 2, 16, 15>}, {transform_indices = @transform_8, window_bounds = array<i64: 2, 16, 14>}, {transform_indices = @transform_9, window_bounds = array<i64: 2, 16, 13>}]} {
    %c0 = arith.constant 0 : index
    %c0_0 = arith.constant 0 : index
    %0 = vector.load %arg2[%c0, %c0_0] : memref<16x16xf32, #tpu.memory_space<vmem>>, vector<16x16xf32>
    %c0_1 = arith.constant 0 : index
    %c0_2 = arith.constant 0 : index
    %1 = vector.load %arg5[%c0_1, %c0_2] : memref<16x1xf32, #tpu.memory_space<vmem>>, vector<16x1xf32>
    %c0_3 = arith.constant 0 : index
    %c0_4 = arith.constant 0 : index
    %c0_5 = arith.constant 0 : index
    %2 = vector.load %arg1[%c0_3, %c0_4, %c0_5] : memref<2x16x8xf32, #tpu.memory_space<vmem>>, vector<1x15x8xf32>
    %3 = vector.shape_cast %2 : vector<1x15x8xf32> to vector<15x8xf32>
    %c0_6 = arith.constant 0 : index
    %c1 = arith.constant 1 : index
    %c0_7 = arith.constant 0 : index
    %4 = vector.load %arg1[%c0_6, %c1, %c0_7] : memref<2x16x8xf32, #tpu.memory_space<vmem>>, vector<1x15x8xf32>
    %5 = vector.shape_cast %4 : vector<1x15x8xf32> to vector<15x8xf32>
    %6 = tpu.concatenate %3, %5 in 1 : vector<15x8xf32>, vector<15x8xf32> -> vector<15x16xf32>
    %cst = arith.constant dense<0.000000e+00> : vector<16x15xf32>
    %7 = tpu.matmul %0, %6, %cst {dimension_numbers = #tpu.dot_dimension_numbers<[1], [1], [0], [0], [0, 0, 1, 0], [], []>} : vector<16x16xf32>, vector<15x16xf32>, vector<16x15xf32> -> vector<16x15xf32>
    %8 = vector.broadcast %1 : vector<16x1xf32> to vector<16x15xf32>
    %9 = arith.addf %7, %8 : vector<16x15xf32>
    %cst_8 = arith.constant 0.000000e+00 : f32
    %10 = vector.broadcast %cst_8 : f32 to vector<16x15xf32>
    %11 = arith.maximumf %9, %10 : vector<16x15xf32>
    %c0_9 = arith.constant 0 : index
    %c0_10 = arith.constant 0 : index
    %c0_11 = arith.constant 0 : index
    %12 = vector.load %arg8[%c0_9, %c0_10, %c0_11] : memref<2x16x15xf32, #tpu.memory_space<vmem>>, vector<1x16x15xf32>
    %13 = vector.shape_cast %12 : vector<1x16x15xf32> to vector<16x15xf32>
    %14 = vector.shape_cast %11 : vector<16x15xf32> to vector<1x16x15xf32>
    tpu.vector_store %arg8[%c0_9, %c0_10, %c0_11], %14 {strides = array<i32>} : memref<2x16x15xf32, #tpu.memory_space<vmem>>, vector<1x16x15xf32>,
    %c1_12 = arith.constant 1 : index
    %c0_13 = arith.constant 0 : index
    %c0_14 = arith.constant 0 : index
    %15 = vector.load %arg1[%c1_12, %c0_13, %c0_14] : memref<2x16x8xf32, #tpu.memory_space<vmem>>, vector<1x15x8xf32>
    %16 = vector.shape_cast %15 : vector<1x15x8xf32> to vector<15x8xf32>
    %c1_15 = arith.constant 1 : index
    %c1_16 = arith.constant 1 : index
    %c0_17 = arith.constant 0 : index
    %17 = vector.load %arg1[%c1_15, %c1_16, %c0_17] : memref<2x16x8xf32, #tpu.memory_space<vmem>>, vector<1x15x8xf32>
    %18 = vector.shape_cast %17 : vector<1x15x8xf32> to vector<15x8xf32>
    %19 = tpu.concatenate %16, %18 in 1 : vector<15x8xf32>, vector<15x8xf32> -> vector<15x16xf32>
    %cst_18 = arith.constant dense<0.000000e+00> : vector<16x15xf32>
    %20 = tpu.matmul %0, %19, %cst_18 {dimension_numbers = #tpu.dot_dimension_numbers<[1], [1], [0], [0], [0, 0, 1, 0], [], []>} : vector<16x16xf32>, vector<15x16xf32>, vector<16x15xf32> -> vector<16x15xf32>
    %21 = vector.broadcast %1 : vector<16x1xf32> to vector<16x15xf32>
    %22 = arith.addf %20, %21 : vector<16x15xf32>
    %cst_19 = arith.constant 0.000000e+00 : f32
    %23 = vector.broadcast %cst_19 : f32 to vector<16x15xf32>
    %24 = arith.maximumf %22, %23 : vector<16x15xf32>
    %c1_20 = arith.constant 1 : index
    %c0_21 = arith.constant 0 : index
    %c0_22 = arith.constant 0 : index
    %25 = vector.load %arg8[%c1_20, %c0_21, %c0_22] : memref<2x16x15xf32, #tpu.memory_space<vmem>>, vector<1x16x15xf32>
    %26 = vector.shape_cast %25 : vector<1x16x15xf32> to vector<16x15xf32>
    %27 = vector.shape_cast %24 : vector<16x15xf32> to vector<1x16x15xf32>
    tpu.vector_store %arg8[%c1_20, %c0_21, %c0_22], %27 {strides = array<i32>} : memref<2x16x15xf32, #tpu.memory_space<vmem>>, vector<1x16x15xf32>,
    %c0_23 = arith.constant 0 : index
    %c0_24 = arith.constant 0 : index
    %28 = vector.load %arg3[%c0_23, %c0_24] : memref<16x24xf32, #tpu.memory_space<vmem>>, vector<16x24xf32>
    %c0_25 = arith.constant 0 : index
    %c0_26 = arith.constant 0 : index
    %29 = vector.load %arg6[%c0_25, %c0_26] : memref<16x1xf32, #tpu.memory_space<vmem>>, vector<16x1xf32>
    %c0_27 = arith.constant 0 : index
    %c0_28 = arith.constant 0 : index
    %c0_29 = arith.constant 0 : index
    %30 = vector.load %arg1[%c0_27, %c0_28, %c0_29] : memref<2x16x8xf32, #tpu.memory_space<vmem>>, vector<1x14x8xf32>
    %31 = vector.shape_cast %30 : vector<1x14x8xf32> to vector<14x8xf32>
    %c0_30 = arith.constant 0 : index
    %c1_31 = arith.constant 1 : index
    %c0_32 = arith.constant 0 : index
    %32 = vector.load %arg1[%c0_30, %c1_31, %c0_32] : memref<2x16x8xf32, #tpu.memory_space<vmem>>, vector<1x14x8xf32>
    %33 = vector.shape_cast %32 : vector<1x14x8xf32> to vector<14x8xf32>
    %c0_33 = arith.constant 0 : index
    %c2 = arith.constant 2 : index
    %c0_34 = arith.constant 0 : index
    %34 = vector.load %arg1[%c0_33, %c2, %c0_34] : memref<2x16x8xf32, #tpu.memory_space<vmem>>, vector<1x14x8xf32>
    %35 = vector.shape_cast %34 : vector<1x14x8xf32> to vector<14x8xf32>
    %36 = tpu.concatenate %31, %33, %35 in 1 : vector<14x8xf32>, vector<14x8xf32>, vector<14x8xf32> -> vector<14x24xf32>
    %cst_35 = arith.constant dense<0.000000e+00> : vector<16x14xf32>
    %37 = tpu.matmul %28, %36, %cst_35 {dimension_numbers = #tpu.dot_dimension_numbers<[1], [1], [0], [0], [0, 0, 1, 0], [], []>} : vector<16x24xf32>, vector<14x24xf32>, vector<16x14xf32> -> vector<16x14xf32>
    %38 = vector.broadcast %29 : vector<16x1xf32> to vector<16x14xf32>
    %39 = arith.addf %37, %38 : vector<16x14xf32>
    %cst_36 = arith.constant 0.000000e+00 : f32
    %40 = vector.broadcast %cst_36 : f32 to vector<16x14xf32>
    %41 = arith.maximumf %39, %40 : vector<16x14xf32>
    %c0_37 = arith.constant 0 : index
    %c0_38 = arith.constant 0 : index
    %c0_39 = arith.constant 0 : index
    %42 = vector.load %arg9[%c0_37, %c0_38, %c0_39] : memref<2x16x14xf32, #tpu.memory_space<vmem>>, vector<1x16x14xf32>
    %43 = vector.shape_cast %42 : vector<1x16x14xf32> to vector<16x14xf32>
    %44 = vector.shape_cast %41 : vector<16x14xf32> to vector<1x16x14xf32>
    tpu.vector_store %arg9[%c0_37, %c0_38, %c0_39], %44 {strides = array<i32>} : memref<2x16x14xf32, #tpu.memory_space<vmem>>, vector<1x16x14xf32>,
    %c1_40 = arith.constant 1 : index
    %c0_41 = arith.constant 0 : index
    %c0_42 = arith.constant 0 : index
    %45 = vector.load %arg1[%c1_40, %c0_41, %c0_42] : memref<2x16x8xf32, #tpu.memory_space<vmem>>, vector<1x14x8xf32>
    %46 = vector.shape_cast %45 : vector<1x14x8xf32> to vector<14x8xf32>
    %c1_43 = arith.constant 1 : index
    %c1_44 = arith.constant 1 : index
    %c0_45 = arith.constant 0 : index
    %47 = vector.load %arg1[%c1_43, %c1_44, %c0_45] : memref<2x16x8xf32, #tpu.memory_space<vmem>>, vector<1x14x8xf32>
    %48 = vector.shape_cast %47 : vector<1x14x8xf32> to vector<14x8xf32>
    %c1_46 = arith.constant 1 : index
    %c2_47 = arith.constant 2 : index
    %c0_48 = arith.constant 0 : index
    %49 = vector.load %arg1[%c1_46, %c2_47, %c0_48] : memref<2x16x8xf32, #tpu.memory_space<vmem>>, vector<1x14x8xf32>
    %50 = vector.shape_cast %49 : vector<1x14x8xf32> to vector<14x8xf32>
    %51 = tpu.concatenate %46, %48, %50 in 1 : vector<14x8xf32>, vector<14x8xf32>, vector<14x8xf32> -> vector<14x24xf32>
    %cst_49 = arith.constant dense<0.000000e+00> : vector<16x14xf32>
    %52 = tpu.matmul %28, %51, %cst_49 {dimension_numbers = #tpu.dot_dimension_numbers<[1], [1], [0], [0], [0, 0, 1, 0], [], []>} : vector<16x24xf32>, vector<14x24xf32>, vector<16x14xf32> -> vector<16x14xf32>
    %53 = vector.broadcast %29 : vector<16x1xf32> to vector<16x14xf32>
    %54 = arith.addf %52, %53 : vector<16x14xf32>
    %cst_50 = arith.constant 0.000000e+00 : f32
    %55 = vector.broadcast %cst_50 : f32 to vector<16x14xf32>
    %56 = arith.maximumf %54, %55 : vector<16x14xf32>
    %c1_51 = arith.constant 1 : index
    %c0_52 = arith.constant 0 : index
    %c0_53 = arith.constant 0 : index
    %57 = vector.load %arg9[%c1_51, %c0_52, %c0_53] : memref<2x16x14xf32, #tpu.memory_space<vmem>>, vector<1x16x14xf32>
    %58 = vector.shape_cast %57 : vector<1x16x14xf32> to vector<16x14xf32>
    %59 = vector.shape_cast %56 : vector<16x14xf32> to vector<1x16x14xf32>
    tpu.vector_store %arg9[%c1_51, %c0_52, %c0_53], %59 {strides = array<i32>} : memref<2x16x14xf32, #tpu.memory_space<vmem>>, vector<1x16x14xf32>,
    %c0_54 = arith.constant 0 : index
    %c0_55 = arith.constant 0 : index
    %60 = vector.load %arg4[%c0_54, %c0_55] : memref<16x32xf32, #tpu.memory_space<vmem>>, vector<16x32xf32>
    %c0_56 = arith.constant 0 : index
    %c0_57 = arith.constant 0 : index
    %61 = vector.load %arg7[%c0_56, %c0_57] : memref<16x1xf32, #tpu.memory_space<vmem>>, vector<16x1xf32>
    %c0_58 = arith.constant 0 : index
    %c0_59 = arith.constant 0 : index
    %c0_60 = arith.constant 0 : index
    %62 = vector.load %arg1[%c0_58, %c0_59, %c0_60] : memref<2x16x8xf32, #tpu.memory_space<vmem>>, vector<1x13x8xf32>
    %63 = vector.shape_cast %62 : vector<1x13x8xf32> to vector<13x8xf32>
    %c0_61 = arith.constant 0 : index
    %c1_62 = arith.constant 1 : index
    %c0_63 = arith.constant 0 : index
    %64 = vector.load %arg1[%c0_61, %c1_62, %c0_63] : memref<2x16x8xf32, #tpu.memory_space<vmem>>, vector<1x13x8xf32>
    %65 = vector.shape_cast %64 : vector<1x13x8xf32> to vector<13x8xf32>
    %c0_64 = arith.constant 0 : index
    %c2_65 = arith.constant 2 : index
    %c0_66 = arith.constant 0 : index
    %66 = vector.load %arg1[%c0_64, %c2_65, %c0_66] : memref<2x16x8xf32, #tpu.memory_space<vmem>>, vector<1x13x8xf32>
    %67 = vector.shape_cast %66 : vector<1x13x8xf32> to vector<13x8xf32>
    %c0_67 = arith.constant 0 : index
    %c3 = arith.constant 3 : index
    %c0_68 = arith.constant 0 : index
    %68 = vector.load %arg1[%c0_67, %c3, %c0_68] : memref<2x16x8xf32, #tpu.memory_space<vmem>>, vector<1x13x8xf32>
    %69 = vector.shape_cast %68 : vector<1x13x8xf32> to vector<13x8xf32>
    %70 = tpu.concatenate %63, %65, %67, %69 in 1 : vector<13x8xf32>, vector<13x8xf32>, vector<13x8xf32>, vector<13x8xf32> -> vector<13x32xf32>
    %cst_69 = arith.constant dense<0.000000e+00> : vector<16x13xf32>
    %71 = tpu.matmul %60, %70, %cst_69 {dimension_numbers = #tpu.dot_dimension_numbers<[1], [1], [0], [0], [0, 0, 1, 0], [], []>} : vector<16x32xf32>, vector<13x32xf32>, vector<16x13xf32> -> vector<16x13xf32>
    %72 = vector.broadcast %61 : vector<16x1xf32> to vector<16x13xf32>
    %73 = arith.addf %71, %72 : vector<16x13xf32>
    %cst_70 = arith.constant 0.000000e+00 : f32
    %74 = vector.broadcast %cst_70 : f32 to vector<16x13xf32>
    %75 = arith.maximumf %73, %74 : vector<16x13xf32>
    %c0_71 = arith.constant 0 : index
    %c0_72 = arith.constant 0 : index
    %c0_73 = arith.constant 0 : index
    %76 = vector.load %arg10[%c0_71, %c0_72, %c0_73] : memref<2x16x13xf32, #tpu.memory_space<vmem>>, vector<1x16x13xf32>
    %77 = vector.shape_cast %76 : vector<1x16x13xf32> to vector<16x13xf32>
    %78 = vector.shape_cast %75 : vector<16x13xf32> to vector<1x16x13xf32>
    tpu.vector_store %arg10[%c0_71, %c0_72, %c0_73], %78 {strides = array<i32>} : memref<2x16x13xf32, #tpu.memory_space<vmem>>, vector<1x16x13xf32>,
    %c1_74 = arith.constant 1 : index
    %c0_75 = arith.constant 0 : index
    %c0_76 = arith.constant 0 : index
    %79 = vector.load %arg1[%c1_74, %c0_75, %c0_76] : memref<2x16x8xf32, #tpu.memory_space<vmem>>, vector<1x13x8xf32>
    %80 = vector.shape_cast %79 : vector<1x13x8xf32> to vector<13x8xf32>
    %c1_77 = arith.constant 1 : index
    %c1_78 = arith.constant 1 : index
    %c0_79 = arith.constant 0 : index
    %81 = vector.load %arg1[%c1_77, %c1_78, %c0_79] : memref<2x16x8xf32, #tpu.memory_space<vmem>>, vector<1x13x8xf32>
    %82 = vector.shape_cast %81 : vector<1x13x8xf32> to vector<13x8xf32>
    %c1_80 = arith.constant 1 : index
    %c2_81 = arith.constant 2 : index
    %c0_82 = arith.constant 0 : index
    %83 = vector.load %arg1[%c1_80, %c2_81, %c0_82] : memref<2x16x8xf32, #tpu.memory_space<vmem>>, vector<1x13x8xf32>
    %84 = vector.shape_cast %83 : vector<1x13x8xf32> to vector<13x8xf32>
    %c1_83 = arith.constant 1 : index
    %c3_84 = arith.constant 3 : index
    %c0_85 = arith.constant 0 : index
    %85 = vector.load %arg1[%c1_83, %c3_84, %c0_85] : memref<2x16x8xf32, #tpu.memory_space<vmem>>, vector<1x13x8xf32>
    %86 = vector.shape_cast %85 : vector<1x13x8xf32> to vector<13x8xf32>
    %87 = tpu.concatenate %80, %82, %84, %86 in 1 : vector<13x8xf32>, vector<13x8xf32>, vector<13x8xf32>, vector<13x8xf32> -> vector<13x32xf32>
    %cst_86 = arith.constant dense<0.000000e+00> : vector<16x13xf32>
    %88 = tpu.matmul %60, %87, %cst_86 {dimension_numbers = #tpu.dot_dimension_numbers<[1], [1], [0], [0], [0, 0, 1, 0], [], []>} : vector<16x32xf32>, vector<13x32xf32>, vector<16x13xf32> -> vector<16x13xf32>
    %89 = vector.broadcast %61 : vector<16x1xf32> to vector<16x13xf32>
    %90 = arith.addf %88, %89 : vector<16x13xf32>
    %cst_87 = arith.constant 0.000000e+00 : f32
    %91 = vector.broadcast %cst_87 : f32 to vector<16x13xf32>
    %92 = arith.maximumf %90, %91 : vector<16x13xf32>
    %c1_88 = arith.constant 1 : index
    %c0_89 = arith.constant 0 : index
    %c0_90 = arith.constant 0 : index
    %93 = vector.load %arg10[%c1_88, %c0_89, %c0_90] : memref<2x16x13xf32, #tpu.memory_space<vmem>>, vector<1x16x13xf32>
    %94 = vector.shape_cast %93 : vector<1x16x13xf32> to vector<16x13xf32>
    %95 = vector.shape_cast %92 : vector<16x13xf32> to vector<1x16x13xf32>
    tpu.vector_store %arg10[%c1_88, %c0_89, %c0_90], %95 {strides = array<i32>} : memref<2x16x13xf32, #tpu.memory_space<vmem>>, vector<1x16x13xf32>,
    return
  }
  func.func @transform_0(%arg0: i32) -> (i32, i32, i32) {
    %c0_i32 = arith.constant 0 : i32
    %c0_i32_0 = arith.constant 0 : i32
    %c0_i32_1 = arith.constant 0 : i32
    return %arg0, %c0_i32, %c0_i32_0 : i32, i32, i32
  }
  func.func @transform_1(%arg0: i32) -> (i32, i32) {
    %c0_i32 = arith.constant 0 : i32
    %c0_i32_0 = arith.constant 0 : i32
    %c0_i32_1 = arith.constant 0 : i32
    return %c0_i32, %c0_i32_0 : i32, i32
  }
  func.func @transform_2(%arg0: i32) -> (i32, i32) {
    %c0_i32 = arith.constant 0 : i32
    %c0_i32_0 = arith.constant 0 : i32
    %c0_i32_1 = arith.constant 0 : i32
    return %c0_i32, %c0_i32_0 : i32, i32
  }
  func.func @transform_3(%arg0: i32) -> (i32, i32) {
    %c0_i32 = arith.constant 0 : i32
    %c0_i32_0 = arith.constant 0 : i32
    %c0_i32_1 = arith.constant 0 : i32
    return %c0_i32, %c0_i32_0 : i32, i32
  }
  func.func @transform_4(%arg0: i32) -> (i32, i32) {
    %c0_i32 = arith.constant 0 : i32
    %c0_i32_0 = arith.constant 0 : i32
    %c0_i32_1 = arith.constant 0 : i32
    return %c0_i32, %c0_i32_0 : i32, i32
  }
  func.func @transform_5(%arg0: i32) -> (i32, i32) {
    %c0_i32 = arith.constant 0 : i32
    %c0_i32_0 = arith.constant 0 : i32
    %c0_i32_1 = arith.constant 0 : i32
    return %c0_i32, %c0_i32_0 : i32, i32
  }
  func.func @transform_6(%arg0: i32) -> (i32, i32) {
    %c0_i32 = arith.constant 0 : i32
    %c0_i32_0 = arith.constant 0 : i32
    %c0_i32_1 = arith.constant 0 : i32
    return %c0_i32, %c0_i32_0 : i32, i32
  }
  func.func @transform_7(%arg0: i32) -> (i32, i32, i32) {
    %c0_i32 = arith.constant 0 : i32
    %c0_i32_0 = arith.constant 0 : i32
    %c0_i32_1 = arith.constant 0 : i32
    return %arg0, %c0_i32, %c0_i32_0 : i32, i32, i32
  }
  func.func @transform_8(%arg0: i32) -> (i32, i32, i32) {
    %c0_i32 = arith.constant 0 : i32
    %c0_i32_0 = arith.constant 0 : i32
    %c0_i32_1 = arith.constant 0 : i32
    return %arg0, %c0_i32, %c0_i32_0 : i32, i32, i32
  }
  func.func @transform_9(%arg0: i32) -> (i32, i32, i32) {
    %c0_i32 = arith.constant 0 : i32
    %c0_i32_0 = arith.constant 0 : i32
    %c0_i32_1 = arith.constant 0 : i32
    return %arg0, %c0_i32, %c0_i32_0 : i32, i32, i32
  }
}

</mosaic_0001>

<bundles_post_ra>
// kernel: tpu_custom_call.1
= control target key start
LH: loop header
LB: loop body
LE: loop exit
PB: predicated region body
PF: predicated region fallthrough
CT: control target
= control target key end

     0   :  { %s898_s13 = smov 8   ;;  %vm58_vm0 = vcmask 130048   ;;  %s899_s28 = smov 16   ;;  %v901_v17 = vmov 0   ;;  %vm45_vm1 = vcmask 64512   ;;  %vm292_vm2 = vcmask 195584   ;;  %s1184_s0 = inlined_call_operand.vmem [shape: f32[2,16,8], index: 0, kind: input, shape index: {}]   ;;  %s1185_s1 = inlined_call_operand.vmem [shape: f32[16,16], index: 1, kind: input, shape index: {}]   ;;  %s1186_s4 = inlined_call_operand.vmem [shape: f32[16,1], index: 4, kind: input, shape index: {}]   ;;  %s1187_s5 = inlined_call_operand.vmem [shape: f32[16,1], index: 5, kind: input, shape index: {}]   ;;  %s1188_s6 = inlined_call_operand.vmem [shape: f32[16,1], index: 6, kind: input, shape index: {}]   ;;  %s1189_s2 = inlined_call_operand.vmem [shape: f32[16,24], index: 2, kind: input, shape index: {}]   ;;  %s1190_s3 = inlined_call_operand.vmem [shape: f32[16,32], index: 3, kind: input, shape index: {}]   ;;  %s1191_s7 = inlined_call_operand.vmem [shape: f32[2,16,15], index: 7, kind: output, shape index: {0}]   ;;  %s1192_s8 = inlined_call_operand.vmem [shape: f32[2,16,14], index: 8, kind: output, shape index: {1}]   ;;  %s1193_s9 = inlined_call_operand.vmem [shape: f32[2,16,13], index: 9, kind: output, shape index: {2}]  }
   0x1   :  { %v36_v0 = vld [vmem:[%s1184_s0 + $0x9] sm:$0x7f]  ;;  %v35_v1 = vld [vmem:[%s1184_s0 + $0x1] sm:$0xff]  ;;  %v785_v2 = vld [vmem:[%s1184_s0 + $0x19] sm:$0x7f]  ;;  %s900_s25 = smov 24   ;;  %897 = vset.pattern.permute.xlu1 %v901_v17  ;;  %896 = vset.pattern.permute.xlu0 %v901_v17 }
   0x2   :  { %41 = vrot.lane.b32.xlu0 %v36_v0, %s898_s13  ;;  %39 = vrot.lane.b32.xlu1 %v35_v1, %s898_s13  ;;  %v784_v3 = vld [vmem:[%s1184_s0 + $0x11] sm:$0xff]  ;;  %v259_v4 = vld [vmem:[%s1184_s0 + $0x9] sm:$0x3f]  ;;  %vm549_vm3 = vcmask 261120   ;;  %vm148_vm4 = vcmask 121856   ;;  %vm382_vm5 = vcmask 113664  }
   0x3   :  { %v799_v5 = vld [vmem:[%s1184_s0 + $0x19] sm:$0x3f]  ;;  %v29_v6 = vld [vmem:[%s1185_s1] sm:$0xff]  ;;  %v261_v7 = vld [vmem:[%s1184_s0 + $0xa] sm:$0x3f]  ;;  %vm639_vm6 = vcmask 105472  }
   0x4   :  { %v801_v8 = vld [vmem:[%s1184_s0 + $0x1a] sm:$0x3f]  ;;  %854 = vmatprep.mubr.msk.f32.mxu0 %vm58_vm0, %v29_v6  ;;  %861 = vmatprep.mubr.msk.f32.mxu1 %vm58_vm0, %v29_v6  ;;  %v260_v9 = vld [vmem:[%s1184_s0 + $0x2] sm:$0xff]  ;;  %v800_v10 = vld [vmem:[%s1184_s0 + $0x12] sm:$0xff] }
   0x5   :  { %v504_v11 = vld [vmem:[%s1184_s0 + $0x9] sm:$0x1f]  ;;  %v815_v12 = vld [vmem:[%s1184_s0 + $0x19] sm:$0x1f]  ;;  %v31_v20 = vld [vmem:[%s1186_s4] sm:$0xff] }
   0x6   :  { %160 = vrot.lane.b32.xlu0 %v785_v2, %s898_s13  ;;  %158 = vrot.lane.b32.xlu1 %v784_v3, %s898_s13  ;;  %v506_v13 = vld [vmem:[%s1184_s0 + $0xa] sm:$0x1f]  ;;  %v817_v14 = vld [vmem:[%s1184_s0 + $0x1a] sm:$0x1f] }
   0x7   :  { %v508_v15 = vld [vmem:[%s1184_s0 + $0xb] sm:$0x1f]  ;;  %v819_v16 = vld [vmem:[%s1184_s0 + $0x1b] sm:$0x1f]  ;;  %v507_v18 = vld [vmem:[%s1184_s0 + $0x3] sm:$0xff] }
   0x8   :  { %v818_v19 = vld [vmem:[%s1184_s0 + $0x13] sm:$0xff]  ;;  %v32_v21 = vld [vmem:[%s1186_s4 + $0x8] sm:$0xff]  ;;  %v254_v23 = vld [vmem:[%s1187_s5] sm:$0xff] }
   0x9   :  { %v255_v22 = vld [vmem:[%s1187_s5 + $0x8] sm:$0xff]  ;;  %v499_v25 = vld [vmem:[%s1188_s6] sm:$0xff]  ;;  %v783_v31 = vld [vmem:[%s1184_s0 + $0x18] sm:$0x7f] }
   0xa   :  { %266 = vrot.lane.b32.xlu0 %v259_v4, %s898_s13  ;;  %395 = vrot.lane.b32.xlu1 %v799_v5, %s898_s13  ;;  %v500_v24 = vld [vmem:[%s1188_s6 + $0x8] sm:$0xff]  ;;  %v1047_v29 = vld [vmem:[%s1184_s0] sm:$0xff] }
   0xb   :  { %v34_v26 = vld [vmem:[%s1184_s0 + $0x8] sm:$0x7f]  ;;  %v1060_v34 = vld [vmem:[%s1184_s0 + $0x10] sm:$0xff]  ;;  %v252_v41 = vld [vmem:[%s1189_s2] sm:$0xff] }
   0xc   :  { %v30_v38 = vld [vmem:[%s1185_s1 + $0x8] sm:$0xff]  ;;  %v797_v43 = vld [vmem:[%s1184_s0 + $0x18] sm:$0x3f]  ;;  %v497_v61 = vld [vmem:[%s1190_s3] sm:$0xff] }
   0xd   :  { %v257_v42 = vld [vmem:[%s1184_s0 + $0x8] sm:$0x3f]  ;;  %v813_v63 = vld [vmem:[%s1184_s0 + $0x18] sm:$0x1f] }
   0xe   :  { %274 = vrot.lane.b32.xlu0 %v261_v7, %s899_s28  ;;  %403 = vrot.lane.b32.xlu1 %v801_v8, %s899_s28  ;;  %v253_v58 = vld [vmem:[%s1189_s2 + $0x8] sm:$0xff] }
   0xf   :  { %v502_v62 = vld [vmem:[%s1184_s0 + $0x8] sm:$0x1f] }
  0x12   :  { %264 = vrot.lane.b32.xlu0 %v35_v1, %s898_s13  ;;  %393 = vrot.lane.b32.xlu1 %v784_v3, %s898_s13 }
  0x16   :  { %272 = vrot.lane.b32.xlu0 %v260_v9, %s899_s28  ;;  %401 = vrot.lane.b32.xlu1 %v800_v10, %s899_s28 }
  0x1a   :  { %513 = vrot.lane.b32.xlu0 %v504_v11, %s898_s13  ;;  %654 = vrot.lane.b32.xlu1 %v815_v12, %s898_s13 }
  0x1e   :  { %521 = vrot.lane.b32.xlu0 %v506_v13, %s899_s28  ;;  %662 = vrot.lane.b32.xlu1 %v817_v14, %s899_s28 }
  0x22   :  { %529 = vrot.lane.b32.xlu0 %v508_v15, %s900_s25  ;;  %670 = vrot.lane.b32.xlu1 %v819_v16, %s900_s25 }
  0x26   :  { %511 = vrot.lane.b32.xlu0 %v35_v1, %s898_s13  ;;  %652 = vrot.lane.b32.xlu1 %v784_v3, %s898_s13 }
  0x2a   :  { %519 = vrot.lane.b32.xlu0 %v260_v9, %s899_s28  ;;  %660 = vrot.lane.b32.xlu1 %v800_v10, %s899_s28 }
  0x2e   :  { %527 = vrot.lane.b32.xlu0 %v507_v18, %s900_s25  ;;  %668 = vrot.lane.b32.xlu1 %v818_v19, %s900_s25 }
  0x32   :  { %50 = vperm.xlu0 %896, %v31_v20   ;;  %55 = vperm.xlu1 %897, %v32_v21  }
  0x36   :  { %289 = vperm.xlu0 %896, %v255_v22   ;;  %284 = vperm.xlu1 %897, %v254_v23   ;;  %v498_v22 = vld [vmem:[%s1190_s3 + $0x8] sm:$0xff] }
  0x3a   :  { %546 = vperm.xlu0 %896, %v500_v24   ;;  %541 = vperm.xlu1 %897, %v499_v25  }
  0x74   :  { %v42_v27 = vpop.permute.xlu0 %41  ;;  %v40_v28 = vpop.permute.xlu1 %39 }
  0x75   :  { %v47_v30 = vsel %vm45_vm1, %v34_v26, %v42_v27  ;;  %v46_v32 = vsel %vm45_vm1, %v1047_v29, %v40_v28 }
  0x76   :  { %850 = vmatprep.subr.msk.mxu0 %vm58_vm0, %v47_v30 }
  0x77   :  { %851 = vmatpush3.xpose.msk.msra.mxu0 %vm58_vm0, %v47_v30 }
  0x78   :  { %v161_v33 = vpop.permute.xlu0 %160  ;;  %v159_v35 = vpop.permute.xlu1 %158  ;;  %852 = vmatprep.subr.msk.mxu0 %vm58_vm0, %v46_v32 }
  0x79   :  { %v165_v36 = vsel %vm45_vm1, %v783_v31, %v161_v33  ;;  %v164_v37 = vsel %vm45_vm1, %v1060_v34, %v159_v35 }
  0x7a   :  { %857 = vmatprep.subr.msk.mxu1 %vm58_vm0, %v165_v36 }
  0x7b   :  { %853 = vmatpush3.xpose.msk.msra.mxu0 %vm58_vm0, %v46_v32  ;;  %858 = vmatpush3.xpose.msk.msra.mxu1 %vm58_vm0, %v165_v36 }
  0x7c   :  { %v267_v39 = vpop.permute.xlu0 %266  ;;  %859 = vmatprep.subr.msk.mxu1 %vm58_vm0, %v164_v37  ;;  %v396_v40 = vpop.permute.xlu1 %395 }
  0x7d   :  { %v279_v44 = vsel %vm45_vm1, %v257_v42, %v267_v39  ;;  %v408_v45 = vsel %vm45_vm1, %v797_v43, %v396_v40 }
  0x7e   :  { %855 = vmatmul.mubr.msk.f32.vlgmr.msra.gmra.mxu0 %vm58_vm0, %v30_v38 }
  0x7f   :  { %860 = vmatpush3.xpose.msk.msra.mxu1 %vm58_vm0, %v164_v37  ;;  %868 = vmatprep.mubr.msk.f32.mxu0 %vm292_vm2, %v252_v41 }
  0x80   :  { %v275_v46 = vpop.permute.xlu0 %274  ;;  %v404_v47 = vpop.permute.xlu1 %403 }
  0x81   :  { %v281_v48 = vsel %vm58_vm0, %v279_v44, %v275_v46  ;;  %v410_v49 = vsel %vm58_vm0, %v408_v45, %v404_v47 }
  0x82   :  { %864 = vmatprep.subr.msk.mxu0 %vm292_vm2, %v281_v48  ;;  %871 = vmatprep.subr.msk.mxu1 %vm292_vm2, %v410_v49 }
  0x83   :  { %862 = vmatmul.mubr.msk.f32.vlgmr.msra.gmra.mxu1 %vm58_vm0, %v30_v38  ;;  %865 = vmatpush3.xpose.msk.msra.mxu0 %vm292_vm2, %v281_v48 }
  0x84   :  { %872 = vmatpush3.xpose.msk.msra.mxu1 %vm292_vm2, %v410_v49  ;;  %v265_v50 = vpop.permute.xlu0 %264  ;;  %v394_v51 = vpop.permute.xlu1 %393  ;;  %875 = vmatprep.mubr.msk.f32.mxu1 %vm292_vm2, %v252_v41 }
  0x85   :  { %v278_v52 = vsel %vm45_vm1, %v1047_v29, %v265_v50  ;;  %v407_v53 = vsel %vm45_vm1, %v1060_v34, %v394_v51 }
  0x88   :  { %v273_v54 = vpop.permute.xlu0 %272  ;;  %v402_v55 = vpop.permute.xlu1 %401 }
  0x89   :  { %v280_v56 = vsel %vm58_vm0, %v278_v52, %v273_v54  ;;  %v409_v57 = vsel %vm58_vm0, %v407_v53, %v402_v55 }
  0x8a   :  { %866 = vmatprep.subr.msk.mxu0 %vm292_vm2, %v280_v56  ;;  %873 = vmatprep.subr.msk.mxu1 %vm292_vm2, %v409_v57 }
  0x8b   :  { %867 = vmatpush3.xpose.msk.msra.mxu0 %vm292_vm2, %v280_v56  ;;  %874 = vmatpush3.xpose.msk.msra.mxu1 %vm292_vm2, %v409_v57 }
  0x8c   :  { %v514_v59 = vpop.permute.xlu0 %513  ;;  %v655_v60 = vpop.permute.xlu1 %654 }
  0x8d   :  { %v534_v2 = vsel %vm45_vm1, %v502_v62, %v514_v59  ;;  %v675_v3 = vsel %vm45_vm1, %v813_v63, %v655_v60 }
  0x8e   :  { %869 = vmatmul.mubr.msk.f32.vlgmr.msra.gmra.mxu0 %vm292_vm2, %v253_v58  ;;  %876 = vmatmul.mubr.msk.f32.vlgmr.msra.gmra.mxu1 %vm292_vm2, %v253_v58 }
  0x8f   :  { %882 = vmatprep.mubr.msk.f32.mxu0 %vm549_vm3, %v497_v61  ;;  %889 = vmatprep.mubr.msk.f32.mxu1 %vm549_vm3, %v497_v61 }
  0x90   :  { %v522_v0 = vpop.permute.xlu0 %521  ;;  %v663_v1 = vpop.permute.xlu1 %662 }
  0x91   :  { %v536_v4 = vsel %vm58_vm0, %v534_v2, %v522_v0  ;;  %v677_v5 = vsel %vm58_vm0, %v675_v3, %v663_v1 }
  0x94   :  { %v530_v6 = vpop.permute.xlu0 %529  ;;  %v671_v7 = vpop.permute.xlu1 %670 }
  0x95   :  { %v538_v8 = vsel %vm292_vm2, %v536_v4, %v530_v6  ;;  %v679_v9 = vsel %vm292_vm2, %v677_v5, %v671_v7 }
  0x96   :  { %878 = vmatprep.subr.msk.mxu0 %vm549_vm3, %v538_v8  ;;  %885 = vmatprep.subr.msk.mxu1 %vm549_vm3, %v679_v9 }
  0x97   :  { %879 = vmatpush3.xpose.msk.msra.mxu0 %vm549_vm3, %v538_v8  ;;  %886 = vmatpush3.xpose.msk.msra.mxu1 %vm549_vm3, %v679_v9 }
  0x98   :  { %v512_v10 = vpop.permute.xlu0 %511  ;;  %v653_v11 = vpop.permute.xlu1 %652 }
  0x99   :  { %v533_v14 = vsel %vm45_vm1, %v1047_v29, %v512_v10  ;;  %v674_v15 = vsel %vm45_vm1, %v1060_v34, %v653_v11 }
  0x9c   :  { %v520_v12 = vpop.permute.xlu0 %519  ;;  %v661_v13 = vpop.permute.xlu1 %660 }
  0x9d   :  { %v535_v16 = vsel %vm58_vm0, %v533_v14, %v520_v12  ;;  %v676_v17 = vsel %vm58_vm0, %v674_v15, %v661_v13 }
  0xa0   :  { %v528_v18 = vpop.permute.xlu0 %527  ;;  %v669_v19 = vpop.permute.xlu1 %668 }
  0xa1   :  { %v537_v20 = vsel %vm292_vm2, %v535_v16, %v528_v18  ;;  %v678_v21 = vsel %vm292_vm2, %v676_v17, %v669_v19 }
  0xa2   :  { %880 = vmatprep.subr.msk.mxu0 %vm549_vm3, %v537_v20  ;;  %887 = vmatprep.subr.msk.mxu1 %vm549_vm3, %v678_v21 }
  0xa3   :  { %881 = vmatpush3.xpose.msk.msra.mxu0 %vm549_vm3, %v537_v20  ;;  %888 = vmatpush3.xpose.msk.msra.mxu1 %vm549_vm3, %v678_v21 }
  0xa6   :  { %883 = vmatmul.mubr.msk.f32.vlgmr.msra.gmra.mxu0 %vm549_vm3, %v498_v22  ;;  %890 = vmatmul.mubr.msk.f32.vlgmr.msra.gmra.mxu1 %vm549_vm3, %v498_v22 }
  0xad   :  { %v56_v23 = vpop.permute.xlu1 %55  ;;  %v51_v25 = vpop.permute.xlu0 %50 }
  0xb1   :  { %v290_v37 = vpop.permute.xlu0 %289  ;;  %v285_v40 = vpop.permute.xlu1 %284 }
  0xb5   :  { %v547_v51 = vpop.permute.xlu0 %546  ;;  %v542_v54 = vpop.permute.xlu1 %541 }
 0x13e   :  { %v856_v24 = vpop.f32.mrf.mxu0 }
 0x13f   :  { %v143_v26 = vadd.f32 %v856_v24, %v56_v23 }
 0x140   :  { %v137_v27 = vpop.f32.mrf.mxu0 }
 0x141   :  { %v147_v28 = vmax.f32 %v143_v26, 0.0  ;;  %v138_v29 = vadd.f32 %v137_v27, %v51_v25 }
 0x143   :  { %v863_v30 = vpop.f32.mrf.mxu1  ;;  %150 = vst.msk [vmem:[%s1191_s7 + $0x8] sm:$0xff] %vm148_vm4, %v147_v28  ;;  %v146_v31 = vmax.f32 %v138_v29, 0.0 }
 0x144   :  { %v244_v32 = vadd.f32 %v863_v30, %v56_v23 }
 0x145   :  { %v238_v33 = vpop.f32.mrf.mxu1  ;;  %149 = vst.msk [vmem:[%s1191_s7] sm:$0xff] %vm148_vm4, %v146_v31 }
 0x146   :  { %v239_v34 = vadd.f32 %v238_v33, %v51_v25  ;;  %v248_v35 = vmax.f32 %v244_v32, 0.0 }
 0x148   :  { %v247_v36 = vmax.f32 %v239_v34, 0.0  ;;  %791 = vst.msk [vmem:[%s1191_s7 + $0x18] sm:$0xff] %vm148_vm4, %v248_v35 }
 0x14a   :  { %790 = vst.msk [vmem:[%s1191_s7 + $0x10] sm:$0xff] %vm148_vm4, %v247_v36 }
 0x14e   :  { %v870_v38 = vpop.f32.mrf.mxu0  ;;  %v877_v39 = vpop.f32.mrf.mxu1 }
 0x14f   :  { %v377_v41 = vadd.f32 %v870_v38, %v290_v37  ;;  %v489_v42 = vadd.f32 %v877_v39, %v290_v37 }
 0x150   :  { %v371_v43 = vpop.f32.mrf.mxu0  ;;  %v483_v44 = vpop.f32.mrf.mxu1 }
 0x151   :  { %v381_v45 = vmax.f32 %v377_v41, 0.0  ;;  %v493_v46 = vmax.f32 %v489_v42, 0.0  ;;  %v372_v47 = vadd.f32 %v371_v43, %v285_v40  ;;  %v484_v48 = vadd.f32 %v483_v44, %v285_v40 }
 0x153   :  { %384 = vst.msk [vmem:[%s1192_s8 + $0x8] sm:$0xff] %vm382_vm5, %v381_v45  ;;  %807 = vst.msk [vmem:[%s1192_s8 + $0x18] sm:$0xff] %vm382_vm5, %v493_v46  ;;  %v380_v49 = vmax.f32 %v372_v47, 0.0  ;;  %v492_v50 = vmax.f32 %v484_v48, 0.0 }
 0x155   :  { %383 = vst.msk [vmem:[%s1192_s8] sm:$0xff] %vm382_vm5, %v380_v49  ;;  %806 = vst.msk [vmem:[%s1192_s8 + $0x10] sm:$0xff] %vm382_vm5, %v492_v50 }
 0x166   :  { %v884_v52 = vpop.f32.mrf.mxu0  ;;  %v891_v53 = vpop.f32.mrf.mxu1 }
 0x167   :  { %v634_v55 = vadd.f32 %v884_v52, %v547_v51  ;;  %v758_v56 = vadd.f32 %v891_v53, %v547_v51 }
 0x168   :  { %v628_v57 = vpop.f32.mrf.mxu0  ;;  %v752_v58 = vpop.f32.mrf.mxu1 }
 0x169   :  { %v638_v59 = vmax.f32 %v634_v55, 0.0  ;;  %v762_v60 = vmax.f32 %v758_v56, 0.0  ;;  %v629_v61 = vadd.f32 %v628_v57, %v542_v54  ;;  %v753_v62 = vadd.f32 %v752_v58, %v542_v54 }
 0x16b   :  { %641 = vst.msk [vmem:[%s1193_s9 + $0x8] sm:$0xff] %vm639_vm6, %v638_v59  ;;  %825 = vst.msk [vmem:[%s1193_s9 + $0x18] sm:$0xff] %vm639_vm6, %v762_v60  ;;  %v637_v63 = vmax.f32 %v629_v61, 0.0  ;;  %v761_v0 = vmax.f32 %v753_v62, 0.0 }
 0x16d   :  { %640 = vst.msk [vmem:[%s1193_s9] sm:$0xff] %vm639_vm6, %v637_v63  ;;  %824 = vst.msk [vmem:[%s1193_s9 + $0x10] sm:$0xff] %vm639_vm6, %v761_v0 }

</bundles_post_ra>
